<compile_context>
chip_gen: v7x
topology: tpu7x:2x2x1
jax: 0.10.0
libtpu: 0.0.40
codegen_flags: <defaults>
</compile_context>

<pallas_src>
import numpy as np
import jax
import jax.numpy as jnp
from jax.experimental import pallas as pl
from jax.experimental.pallas import tpu as pltpu


def _round_up(x, m):
    return ((x + m - 1) // m) * m


def _cdiv(a, b):
    return -(-a // b)


# ----------------------------------------------------------------------------
# ViewTransformation: per-view MLP (Linear->ReLU->Linear->ReLU)
# ----------------------------------------------------------------------------
def _view_transform_kernel(x_ref, w1_ref, b1_ref, w2_ref, b2_ref, o_ref, h_ref):
    # x_ref : (B, C, fv_dim)  f32      w1_ref: (fv_dim, bv_pad) bf16
    # b1_ref: (1, bv_pad)     f32      w2_ref: (bv_pad, tn)     bf16
    # b2_ref: (1, tn)         f32      o_ref : (B, C, tn)       f32
    # h_ref : (B*C, bv_pad)   f32 VMEM scratch (resident across column blocks)
    B, C, fv_dim = x_ref.shape
    bc = B * C
    tn = o_ref.shape[-1]

    # first Linear + ReLU only once per view (column-block axis is innermost)
    @pl.when(pl.program_id(1) == 0)
    def _():
        x = x_ref[...].reshape(bc, fv_dim).astype(w1_ref.dtype)
        h = jnp.dot(x, w1_ref[...], preferred_element_type=jnp.float32)
        h_ref[...] = jnp.maximum(h + b1_ref[...], 0.0)

    # second Linear + ReLU on this column block
    h = h_ref[...].astype(w2_ref.dtype)
    o = jnp.dot(h, w2_ref[...], preferred_element_type=jnp.float32)
    o = jnp.maximum(o + b2_ref[...], 0.0)
    o_ref[...] = o.reshape(B, C, tn).astype(o_ref.dtype)


def pad_view_params(w1, b1, w2, b2, compute_dtype=jnp.bfloat16):
    """Zero-pad bv_dim up to a multiple of 128 (lane-dense) and cast weights.

    w1: (N, fv_dim, bv_dim)  b1: (N, 1, bv_dim)
    w2: (N, bv_dim, bv_dim)  b2: (N, 1, bv_dim)
    Padding is exact: padded W columns / b entries are zero -> ReLU(0) = 0.
    """
    _, _, bv_dim = w1.shape
    bv_pad = _round_up(bv_dim, 128)
    p = bv_pad - bv_dim
    w1p = jnp.pad(w1, ((0, 0), (0, 0), (0, p))).astype(compute_dtype)
    b1p = jnp.pad(b1, ((0, 0), (0, 0), (0, p))).astype(jnp.float32)
    w2p = jnp.pad(w2, ((0, 0), (0, p), (0, p))).astype(compute_dtype)
    b2p = jnp.pad(b2, ((0, 0), (0, 0), (0, p))).astype(jnp.float32)
    return w1p, b1p, w2p, b2p


def view_transformation(feat, w1p, b1p, w2p, b2p, bv_size, *,
                        col_block=512, vmem_limit_bytes=48 * 1024 * 1024):
    """feat: (B, N, C, H, W) f32 -> (B, N, C, bvH, bvW) f32.

    w1p/b1p/w2p/b2p are the padded (bv_pad multiple of 128) per-view params
    from pad_view_params (weights bf16, biases f32).
    """
    B, N, C, H, W = feat.shape
    fv_dim = H * W
    bv_h, bv_w = bv_size
    bv_dim = bv_h * bv_w
    bv_pad = w1p.shape[-1]
    assert bv_pad % 128 == 0 and bv_pad >= bv_dim

    # column tile of the second matmul: largest multiple of 128 that divides
    # bv_pad and is <= col_block (bounds VMEM for w2 at production sizes).
    tn = min(bv_pad, _round_up(col_block, 128))
    while bv_pad % tn != 0:
        tn -= 128
    n_col = bv_pad // tn

    # free (row-major compatible) reshape; no transposes anywhere.
    x = feat.reshape(B, N, C, fv_dim)

    flops = 2 * N * (B * C) * (fv_dim * bv_pad + bv_pad * bv_pad)
    bytes_accessed = int(
        x.size * 4
        + w1p.size * w1p.dtype.itemsize + w2p.size * w2p.dtype.itemsize
        + b1p.size * 4 + b2p.size * 4
        + B * N * C * bv_pad * 4)

    out = pl.pallas_call(
        _view_transform_kernel,
        out_shape=jax.ShapeDtypeStruct((B, N, C, bv_pad), jnp.float32),
        grid=(N, n_col),
        in_specs=[
            pl.BlockSpec((B, None, C, fv_dim), lambda i, j: (0, i, 0, 0)),
            pl.BlockSpec((None, fv_dim, bv_pad), lambda i, j: (i, 0, 0)),
            pl.BlockSpec((None, 1, bv_pad), lambda i, j: (i, 0, 0)),
            pl.BlockSpec((None, bv_pad, tn), lambda i, j: (i, 0, j)),
            pl.BlockSpec((None, 1, tn), lambda i, j: (i, 0, j)),
        ],
        out_specs=pl.BlockSpec((B, None, C, tn), lambda i, j: (0, i, 0, j)),
        scratch_shapes=[pltpu.VMEM((B * C, bv_pad), jnp.float32)],
        compiler_params=pltpu.CompilerParams(
            dimension_semantics=("parallel", "arbitrary"),
            vmem_limit_bytes=vmem_limit_bytes),
        cost_estimate=pl.CostEstimate(flops=flops, transcendentals=0,
                                      bytes_accessed=bytes_accessed),
    )(x, w1p, b1p, w2p, b2p)

    if bv_pad != bv_dim:
        out = out[..., :bv_dim]
    return out.reshape(B, N, C, bv_h, bv_w)


def view_transformation_ref(feat, w1, b1, w2, b2, bv_size,
                            compute_dtype=jnp.bfloat16):
    """Pure-JAX reference of ViewTransformation.forward (same bf16/f32-acc math)."""
    B, N, C, H, W = feat.shape
    x = feat.reshape(B, N, C, H * W)
    outs = []
    for i in range(N):
        xi = x[:, i].astype(compute_dtype)
        h = jnp.dot(xi, w1[i].astype(compute_dtype),
                    preferred_element_type=jnp.float32) + b1[i]
        h = jnp.maximum(h, 0.0)
        o = jnp.dot(h.astype(compute_dtype), w2[i].astype(compute_dtype),
                    preferred_element_type=jnp.float32) + b2[i]
        o = jnp.maximum(o, 0.0)
        outs.append(o.reshape(B, C, bv_size[0], bv_size[1]))
    return jnp.stack(outs, 1)


# ----------------------------------------------------------------------------
# nn.Upsample(scale_factor=2, mode='bilinear', align_corners=True)
# ----------------------------------------------------------------------------
def _upsample_kernel(x_ref, m_ref, o_ref):
    # x: (TILE_BC, H*W), m: (H*W, Ho*Wo) -> o: (TILE_BC, Ho*Wo)
    o_ref[...] = jnp.dot(x_ref[...], m_ref[...],
                         preferred_element_type=jnp.float32)


def _interp_matrix(out_size, in_size):
    """align_corners=True linear interpolation matrix of shape (out, in)."""
    m = np.zeros((out_size, in_size), dtype=np.float32)
    if in_size == 1 or out_size == 1:
        m[:, 0] = 1.0
        return m
    scale = (in_size - 1) / (out_size - 1)
    for o in range(out_size):
        src = o * scale
        i0 = int(np.floor(src))
        i1 = min(i0 + 1, in_size - 1)
        w = np.float32(src - i0)
        m[o, i0] += 1.0 - w
        m[o, i1] += w
    return m


def upsample2x_bilinear(x, *, tile_bc=None):
    """x: (B, C, H, W) -> (B, C, 2H, 2W), bilinear, align_corners=True.

    One combined interpolation matrix kron(Ah, Aw)^T applied to channel blocks:
    channels on sublanes, Ho*Wo (>=128) on lanes, so loads/stores are dense and
    grid-step overhead is amortized over TILE_BC channels.
    # TODO(synk): for very large BEV maps (Ho*Wo in the 10^5 range) switch to a
    # separable row/column two-matmul variant; the dense kron matrix is only
    # intended for small spatial tiles like the ones HDMapNet upsamples here.
    """
    B, C, H, W = x.shape
    Ho, Wo = 2 * H, 2 * W
    hw, howo = H * W, Ho * Wo

    ah = _interp_matrix(Ho, H)
    aw = _interp_matrix(Wo, W)
    mt = jnp.asarray(np.kron(ah, aw).T)            # (H*W, Ho*Wo)

    bc = B * C
    if tile_bc is None:
        tile_bc = min(_round_up(bc, 8), 256)
        # prefer >= 2 grid steps so the v7x TensorCores both get work
        if bc > 8 and _cdiv(bc, tile_bc) < 2:
            tile_bc = _round_up(_cdiv(bc, 2), 8)
    bc_pad = _round_up(bc, tile_bc)

    xf = x.reshape(bc, hw)                         # free reshape
    if bc_pad != bc:
        xf = jnp.pad(xf, ((0, bc_pad - bc), (0, 0)))

    out = pl.pallas_call(
        _upsample_kernel,
        out_shape=jax.ShapeDtypeStruct((bc_pad, howo), jnp.float32),
        grid=(bc_pad // tile_bc,),
        in_specs=[
            pl.BlockSpec((tile_bc, hw), lambda i: (i, 0)),
            pl.BlockSpec((hw, howo), lambda i: (0, 0)),
        ],
        out_specs=pl.BlockSpec((tile_bc, howo), lambda i: (i, 0)),
        compiler_params=pltpu.CompilerParams(
            dimension_semantics=("parallel",)),
        cost_estimate=pl.CostEstimate(
            flops=2 * bc_pad * hw * howo, transcendentals=0,
            bytes_accessed=int((bc_pad * hw + hw * howo + bc_pad * howo) * 4)),
    )(xf, mt)

    if bc_pad != bc:
        out = out[:bc]
    return out.reshape(B, C, Ho, Wo)


def upsample2x_ref(x):
    """Independent gather-based bilinear (align_corners=True) reference."""
    B, C, H, W = x.shape
    Ho, Wo = 2 * H, 2 * W
    ys = jnp.arange(Ho, dtype=jnp.float32) * (H - 1) / (Ho - 1)
    xs = jnp.arange(Wo, dtype=jnp.float32) * (W - 1) / (Wo - 1)
    y0 = jnp.floor(ys).astype(jnp.int32)
    y1 = jnp.minimum(y0 + 1, H - 1)
    wy = (ys - y0)[None, None, :, None]
    x0 = jnp.floor(xs).astype(jnp.int32)
    x1 = jnp.minimum(x0 + 1, W - 1)
    wx = (xs - x0)[None, None, None, :]
    g00 = x[:, :, y0][:, :, :, x0]
    g01 = x[:, :, y0][:, :, :, x1]
    g10 = x[:, :, y1][:, :, :, x0]
    g11 = x[:, :, y1][:, :, :, x1]
    return (g00 * (1 - wy) * (1 - wx) + g01 * (1 - wy) * wx
            + g10 * wy * (1 - wx) + g11 * wy * wx)


# ----------------------------------------------------------------------------
# HDMapNet pose-matrix glue (small 4x4 matrices: plain JAX)
# ----------------------------------------------------------------------------
def get_Ks_RTs_and_post_RTs(intrins, rots, trans, post_rots, post_trans):
    B, N = intrins.shape[:2]
    eye = jnp.eye(4, dtype=jnp.float32)
    Ks = jnp.broadcast_to(eye, (B, N, 4, 4))  # identity, exactly as in PyTorch
    Rs = jnp.tile(eye, (B, N, 1, 1))
    Rs = Rs.at[:, :, :3, :3].set(jnp.swapaxes(rots, -1, -2))
    Ts = jnp.tile(eye, (B, N, 1, 1))
    Ts = Ts.at[:, :, :3, 3].set(-trans)
    RTs = Rs @ Ts
    post_RTs = None
    return Ks, RTs, post_RTs


# ----------------------------------------------------------------------------
# HDMapNet (partial) wrapper
# ----------------------------------------------------------------------------
class HDMapNetPallas:
    """Implements the parts of HDMapNet.forward whose definitions are available.

    # TODO(synk): CamEncode (EfficientNet trunk), IPM, BevEncode (ResNet head) and
    # PointPillarEncoder are external modules whose code was not provided; `forward`
    # consumes camera features (output of get_cam_feats) and stops after view
    # fusion + pose matrices.  The 2x bilinear up-sampler (self.up_sampler) is
    # implemented as `upsample2x_bilinear`.  nn.Dropout2d is identity in eval mode.
    """

    def __init__(self, cam_c, fv_size, bv_size, key, n_views=6,
                 compute_dtype=jnp.bfloat16):
        self.camC = cam_c
        self.fv_size = fv_size
        self.bv_size = bv_size
        self.n_views = n_views
        self.compute_dtype = compute_dtype
        fv_dim = fv_size[0] * fv_size[1]
        bv_dim = bv_size[0] * bv_size[1]
        k1, k2, k3, k4 = jax.random.split(key, 4)
        # deterministic synthetic parameters (stacked per view), kept in f32
        self.w1 = 0.05 * jax.random.normal(k1, (n_views, fv_dim, bv_dim), jnp.float32)
        self.b1 = 0.05 * jax.random.normal(k2, (n_views, 1, bv_dim), jnp.float32)
        self.w2 = 0.05 * jax.random.normal(k3, (n_views, bv_dim, bv_dim), jnp.float32)
        self.b2 = 0.05 * jax.random.normal(k4, (n_views, 1, bv_dim), jnp.float32)
        # lane-padded / bf16-cast copies consumed by the Pallas kernel
        self.w1p, self.b1p, self.w2p, self.b2p = pad_view_params(
            self.w1, self.b1, self.w2, self.b2, compute_dtype)

    def view_fusion(self, img_feat):
        return view_transformation(img_feat, self.w1p, self.b1p, self.w2p,
                                   self.b2p, self.bv_size)

    def view_fusion_ref(self, img_feat):
        return view_transformation_ref(img_feat, self.w1, self.b1, self.w2,
                                       self.b2, self.bv_size, self.compute_dtype)

    def forward(self, img_feat, trans, rots, intrins, post_trans, post_rots):
        x = self.view_fusion(img_feat)
        Ks, RTs, post_RTs = get_Ks_RTs_and_post_RTs(intrins, rots, trans,
                                                    post_rots, post_trans)
        # TODO(synk): topdown = IPM(x, Ks, RTs, ...) then BevEncode(upsample(topdown))
        # cannot be reproduced without the IPM / BevEncode sources.
        return x, Ks, RTs


# ----------------------------------------------------------------------------
# main
# ----------------------------------------------------------------------------
if __name__ == "__main__":
    key = jax.random.PRNGKey(0)
    k_model, k_feat, k_rot, k_trans, k_intr, k_top = jax.random.split(key, 6)

    B, N, camC = 2, 6, 8
    fv_size = (4, 4)     # front-view feature H, W (image_size // 16 in the real model)
    bv_size = (4, 8)     # bird's-eye feature H, W (final_H//5, final_W//5)

    model = HDMapNetPallas(camC, fv_size, bv_size, k_model, n_views=N)

    # inputs at the get_cam_feats output boundary + pose tensors
    img_feat = jax.random.normal(k_feat, (B, N, camC, fv_size[0], fv_size[1]),
                                 jnp.float32)
    rots = jax.random.normal(k_rot, (B, N, 3, 3), jnp.float32)
    trans = jax.random.normal(k_trans, (B, N, 3), jnp.float32)
    intrins = jax.random.normal(k_intr, (B, N, 3, 3), jnp.float32)
    post_rots = jnp.tile(jnp.eye(3, dtype=jnp.float32), (B, N, 1, 1))
    post_trans = jnp.zeros((B, N, 3), jnp.float32)

    # --- view fusion (Pallas) vs. reference ---
    x, Ks, RTs = model.forward(img_feat, trans, rots, intrins, post_trans, post_rots)
    x = jax.block_until_ready(x)
    x_ref = model.view_fusion_ref(img_feat)
    assert x.shape == (B, N, camC, bv_size[0], bv_size[1])
    np.testing.assert_allclose(np.asarray(x), np.asarray(x_ref),
                               rtol=1e-4, atol=1e-4)

    # --- 2x bilinear up-sampler (Pallas) vs. reference ---
    # (IPM output is unavailable, so exercise the up-sampler on a synthetic BEV map.)
    topdown = jax.random.normal(k_top, (B, camC, 8, 8), jnp.float32)
    up = jax.block_until_ready(upsample2x_bilinear(topdown))
    up_ref = upsample2x_ref(topdown)
    assert up.shape == (B, camC, 16, 16)
    np.testing.assert_allclose(np.asarray(up), np.asarray(up_ref),
                               rtol=1e-5, atol=1e-5)

    print("KERNEL_OK")
</pallas_src>

<mosaic_0001>
module attributes {stable_mosaic.version = 11 : i64} {
  func.func @_view_transform_kernel(%arg0: i32, %arg1: i32, %arg2: memref<2x1x8x16xf32, #tpu.memory_space<vmem>>, %arg3: memref<1x16x128xbf16, #tpu.memory_space<vmem>>, %arg4: memref<1x1x128xf32, #tpu.memory_space<vmem>>, %arg5: memref<1x128x128xbf16, #tpu.memory_space<vmem>>, %arg6: memref<1x1x128xf32, #tpu.memory_space<vmem>>, %arg7: memref<2x1x8x128xf32, #tpu.memory_space<vmem>>, %arg8: memref<16x128xf32, #tpu.memory_space<vmem>>) attributes {dimension_semantics = [#tpu.dimension_semantics<parallel>, #tpu.dimension_semantics<arbitrary>], iteration_bounds = array<i64: 6, 1>, scalar_prefetch = 0 : i64, scratch_operands = 1 : i64, tpu.core_type = #tpu.core_type<tc>, window_params = [{transform_indices = @transform_0, window_bounds = array<i64: 2, 1, 8, 16>}, {transform_indices = @transform_1, window_bounds = array<i64: 1, 16, 128>}, {transform_indices = @transform_2, window_bounds = array<i64: 1, 1, 128>}, {transform_indices = @transform_3, window_bounds = array<i64: 1, 128, 128>}, {transform_indices = @transform_4, window_bounds = array<i64: 1, 1, 128>}, {transform_indices = @transform_5, window_bounds = array<i64: 2, 1, 8, 128>}]} {
    %c0_i32 = arith.constant 0 : i32
    %0 = arith.cmpi eq, %arg1, %c0_i32 : i32
    %1 = arith.extui %0 : i1 to i32
    %c0_i32_0 = arith.constant 0 : i32
    %2 = arith.cmpi ne, %1, %c0_i32_0 : i32
    scf.if %2 {
      %c0_13 = arith.constant 0 : index
      %c0_14 = arith.constant 0 : index
      %c0_15 = arith.constant 0 : index
      %c0_16 = arith.constant 0 : index
      %18 = vector.load %arg2[%c0_13, %c0_14, %c0_15, %c0_16] : memref<2x1x8x16xf32, #tpu.memory_space<vmem>>, vector<2x1x8x16xf32>
      %19 = vector.shape_cast %18 : vector<2x1x8x16xf32> to vector<2x8x16xf32>
      %20 = vector.shape_cast %19 : vector<2x8x16xf32> to vector<16x16xf32>
      %21 = arith.truncf %20 : vector<16x16xf32> to vector<16x16xbf16>
      %c0_17 = arith.constant 0 : index
      %c0_18 = arith.constant 0 : index
      %c0_19 = arith.constant 0 : index
      %22 = vector.load %arg3[%c0_17, %c0_18, %c0_19] : memref<1x16x128xbf16, #tpu.memory_space<vmem>>, vector<1x16x128xbf16>
      %23 = vector.shape_cast %22 : vector<1x16x128xbf16> to vector<16x128xbf16>
      %cst_20 = arith.constant dense<0.000000e+00> : vector<16x128xf32>
      %24 = tpu.matmul %21, %23, %cst_20 {dimension_numbers = #tpu.dot_dimension_numbers<[1], [0], [0], [1], [0, 0, 1, 1], [], []>} : vector<16x16xbf16>, vector<16x128xbf16>, vector<16x128xf32> -> vector<16x128xf32>
      %c0_21 = arith.constant 0 : index
      %c0_22 = arith.constant 0 : index
      %c0_23 = arith.constant 0 : index
      %25 = vector.load %arg4[%c0_21, %c0_22, %c0_23] : memref<1x1x128xf32, #tpu.memory_space<vmem>>, vector<1x1x128xf32>
      %26 = vector.shape_cast %25 : vector<1x1x128xf32> to vector<1x128xf32>
      %27 = vector.broadcast %26 : vector<1x128xf32> to vector<16x128xf32>
      %28 = arith.addf %24, %27 : vector<16x128xf32>
      %cst_24 = arith.constant 0.000000e+00 : f32
      %29 = vector.broadcast %cst_24 : f32 to vector<16x128xf32>
      %30 = arith.maximumf %28, %29 : vector<16x128xf32>
      %c0_25 = arith.constant 0 : index
      %c0_26 = arith.constant 0 : index
      %31 = vector.load %arg8[%c0_25, %c0_26] : memref<16x128xf32, #tpu.memory_space<vmem>>, vector<16x128xf32>
      tpu.vector_store %arg8[%c0_25, %c0_26], %30 {strides = array<i32>} : memref<16x128xf32, #tpu.memory_space<vmem>>, vector<16x128xf32>,
    } else {
    }
    %c0 = arith.constant 0 : index
    %c0_1 = arith.constant 0 : index
    %3 = vector.load %arg8[%c0, %c0_1] : memref<16x128xf32, #tpu.memory_space<vmem>>, vector<16x128xf32>
    %4 = arith.truncf %3 : vector<16x128xf32> to vector<16x128xbf16>
    %c0_2 = arith.constant 0 : index
    %c0_3 = arith.constant 0 : index
    %c0_4 = arith.constant 0 : index
    %5 = vector.load %arg5[%c0_2, %c0_3, %c0_4] : memref<1x128x128xbf16, #tpu.memory_space<vmem>>, vector<1x128x128xbf16>
    %6 = vector.shape_cast %5 : vector<1x128x128xbf16> to vector<128x128xbf16>
    %cst = arith.constant dense<0.000000e+00> : vector<16x128xf32>
    %7 = tpu.matmul %4, %6, %cst {dimension_numbers = #tpu.dot_dimension_numbers<[1], [0], [0], [1], [0, 0, 1, 1], [], []>} : vector<16x128xbf16>, vector<128x128xbf16>, vector<16x128xf32> -> vector<16x128xf32>
    %c0_5 = arith.constant 0 : index
    %c0_6 = arith.constant 0 : index
    %c0_7 = arith.constant 0 : index
    %8 = vector.load %arg6[%c0_5, %c0_6, %c0_7] : memref<1x1x128xf32, #tpu.memory_space<vmem>>, vector<1x1x128xf32>
    %9 = vector.shape_cast %8 : vector<1x1x128xf32> to vector<1x128xf32>
    %10 = vector.broadcast %9 : vector<1x128xf32> to vector<16x128xf32>
    %11 = arith.addf %7, %10 : vector<16x128xf32>
    %cst_8 = arith.constant 0.000000e+00 : f32
    %12 = vector.broadcast %cst_8 : f32 to vector<16x128xf32>
    %13 = arith.maximumf %11, %12 : vector<16x128xf32>
    %14 = vector.shape_cast %13 : vector<16x128xf32> to vector<2x8x128xf32>
    %c0_9 = arith.constant 0 : index
    %c0_10 = arith.constant 0 : index
    %c0_11 = arith.constant 0 : index
    %c0_12 = arith.constant 0 : index
    %15 = vector.load %arg7[%c0_9, %c0_10, %c0_11, %c0_12] : memref<2x1x8x128xf32, #tpu.memory_space<vmem>>, vector<2x1x8x128xf32>
    %16 = vector.shape_cast %15 : vector<2x1x8x128xf32> to vector<2x8x128xf32>
    %17 = vector.shape_cast %14 : vector<2x8x128xf32> to vector<2x1x8x128xf32>
    tpu.vector_store %arg7[%c0_9, %c0_10, %c0_11, %c0_12], %17 {strides = array<i32>} : memref<2x1x8x128xf32, #tpu.memory_space<vmem>>, vector<2x1x8x128xf32>,
    return
  }
  func.func @transform_0(%arg0: i32, %arg1: i32) -> (i32, i32, i32, i32) {
    %c0_i32 = arith.constant 0 : i32
    %c0_i32_0 = arith.constant 0 : i32
    %c0_i32_1 = arith.constant 0 : i32
    %c0_i32_2 = arith.constant 0 : i32
    return %c0_i32, %arg0, %c0_i32_0, %c0_i32_1 : i32, i32, i32, i32
  }
  func.func @transform_1(%arg0: i32, %arg1: i32) -> (i32, i32, i32) {
    %c0_i32 = arith.constant 0 : i32
    %c0_i32_0 = arith.constant 0 : i32
    %c0_i32_1 = arith.constant 0 : i32
    return %arg0, %c0_i32, %c0_i32_0 : i32, i32, i32
  }
  func.func @transform_2(%arg0: i32, %arg1: i32) -> (i32, i32, i32) {
    %c0_i32 = arith.constant 0 : i32
    %c0_i32_0 = arith.constant 0 : i32
    %c0_i32_1 = arith.constant 0 : i32
    return %arg0, %c0_i32, %c0_i32_0 : i32, i32, i32
  }
  func.func @transform_3(%arg0: i32, %arg1: i32) -> (i32, i32, i32) {
    %c0_i32 = arith.constant 0 : i32
    %c0_i32_0 = arith.constant 0 : i32
    return %arg0, %c0_i32, %arg1 : i32, i32, i32
  }
  func.func @transform_4(%arg0: i32, %arg1: i32) -> (i32, i32, i32) {
    %c0_i32 = arith.constant 0 : i32
    %c0_i32_0 = arith.constant 0 : i32
    return %arg0, %c0_i32, %arg1 : i32, i32, i32
  }
  func.func @transform_5(%arg0: i32, %arg1: i32) -> (i32, i32, i32, i32) {
    %c0_i32 = arith.constant 0 : i32
    %c0_i32_0 = arith.constant 0 : i32
    %c0_i32_1 = arith.constant 0 : i32
    return %c0_i32, %arg0, %c0_i32_0, %arg1 : i32, i32, i32, i32
  }
}

</mosaic_0001>

<bundles_post_ra>
// kernel: tpu_custom_call.1
= control target key start
LH: loop header
LB: loop body
LE: loop exit
PB: predicated region body
PF: predicated region fallthrough
CT: control target
= control target key end

     0   :  { %s1390_s0 = inlined_call_operand.hbm [shape: f32[2,6,8,16], index: 0, kind: input, shape index: {}]   ;;  %s1391_s1 = inlined_call_operand.hbm [shape: bf16[6,16,128], index: 1, kind: input, shape index: {}]   ;;  %s1392_s2 = inlined_call_operand.vmem [shape: f32[6,1,128], index: 2, kind: input, shape index: {}]   ;;  %s1393_s3 = inlined_call_operand.hbm [shape: bf16[6,128,128], index: 3, kind: input, shape index: {}]   ;;  %s1394_s4 = inlined_call_operand.vmem [shape: f32[6,1,128], index: 4, kind: input, shape index: {}]   ;;  %s1395_s5 = inlined_call_operand.hbm [shape: f32[2,6,8,128], index: 5, kind: output, shape index: {}]  }
   0x1   :  { %1403 = sst [smem:[#allocation17_spill]] %s1390_s0 }
   0x2   :  { %1404 = sst [smem:[#allocation18_spill]] %s1391_s1 }
   0x3   :  { %10 = vsyncpa [#allocation4], 0 }
   0x4   :  { %12 = vsyncpa [#allocation4 + $0x1], 0 }
   0x5   :  { %13 = vsyncpa [#allocation7], 0 }
   0x6   :  { %15 = vsyncpa [#allocation7 + $0x1], 0 }
   0x7   :  { %16 = vsyncpa [#allocation5], 0 }
   0x8   :  { %18 = vsyncpa [#allocation5 + $0x1], 0  ;;  %s1113_s18 = smov 0   ;;  %s1115_s19 = smov 0  }
   0x9   :  { %s1117_s20 = smov 0   ;;  %s1119_s21 = smov 0  }
   0xa   :  { %s1121_s22 = smov 0   ;;  %s1123_s23 = smov 0  }
   0xb LB: > { %1405 = sst [smem:[#allocation13_spill]] %s1055_s20  ;;  %s1144_s24 = sadd.s32 4294967295, %s1067_s23   ;;  %s1067_s23 = sphi %s1123_s23, %s24_s23   ;;  %s1063_s22 = sphi %s1121_s22, %s1432_s22   ;;  %s1059_s21 = sphi %s1119_s21, %s1431_s21   ;;  %s1055_s20 = sphi %s1117_s20, %s1427_s20   ;;  %s1051_s19 = sphi %s1115_s19, %s1430_s19   ;;  %s1047_s18 = sphi %s1113_s18, %s1429_s18  }
   0xc   : > { %s729_s25 = sadd.s32 4294967294, %s1067_s23   ;;  %s36_s26 = sadd.s32 1, %s1063_s22 }
   0xd   : > { %s43_s27 = sadd.s32 1, %s1055_s20  ;;  %p38_p0 = scmp.ge.s32.totalorder %s36_s26, 6 }
   0xe   : > { %p50_p1 = scmp.ne.s32.totalorder %s1055_s20, %s1051_s19  ;;  %p51_p2 = scmp.eq.s32.totalorder %s1067_s23, 0 }
   0xf   : > { %p56_p3 = scmp.ne.s32.totalorder %s1051_s19, %s1047_s18  ;;  %s1434_s26 = smov (%p38_p0, %s36_s26), 0 }
  0x10   : > { %1406 = sst [smem:[#allocation14_spill]] %s1434_s26  ;;  %p1156_p4 = por %p51_p2, %p50_p1 }
  0x11   : > { %p57_p5 = scmp.eq.s32.totalorder %s1144_s24, 0  ;;  %s40_s29 = ssub.s32 %s1063_s22, %s1434_s26 }
  0x12   : > { %p190_p6 = scmp.eq.s32.totalorder %s1144_s24, 5  ;;  %p41_p7 = scmp.eq.s32.totalorder %s40_s29, 0 }
  0x13   : > { %p1164_p8 = por %p57_p5, %p56_p3  ;;  %p196_p10 = scmp.eq.s32.totalorder %s729_s25, 5 }
  0x14   : > { %p1168_p9 = por %p190_p6, %p50_p1  ;;  %p822_p12 = scmp.lt.s32.totalorder %s1067_s23, 6 }
  0x15   : > { %s1408_s30 = scalar_select %p1164_p8, 1, 0 }
  0x16   : > { %s1409_s6 = scalar_select %p1168_p9, 1, 0 }
  0x17   : > { %s1173_s7 = scalar_select %p41_p7, %s1055_s20, %s43_s27  }
  0x18   : > { %p1175_p11 = por %p196_p10, %p56_p3  ;;  %s1181_s9 = sand.u32 1, %s1055_s20  }
  0x19   : > { %1410 = sst [smem:[#allocation15_spill]] %s1173_s7  ;;  %s733_s10 = sshll.u32 %s1063_s22, 7 }
  0x1a   : > { %s1411_s8 = scalar_select %p1175_p11, 1, 0 }
  0x1b   : > { %s236_s11 = sand.u32 1, %s1067_s23   ;;  %s1413_s0 = sld [smem:[#allocation17_spill]] }
  0x1c   : > { %1412 = sst [smem:[#allocation16_spill]] %s1411_s8  ;;  %p1192_p13 = pnand %p822_p12, %p1156_p4 }
  0x1d   : > { %s734_s16 = sshll.u32 %s1181_s9, 3  ;;  %s1415_s1 = sld [smem:[#allocation18_spill]] }
  0x1e   : > { %s240_s29 = scalar_lea.vmem [#allocation6], %s734_s16  ;;  %s1205_s28 = scalar_lea.sflag [#allocation7], %s236_s11 }
  0x1f   : > { %s247_s12 = sshll.u32 %s240_s29, 4  ;;  %p1211_p2 = pneg %p1192_p13  ;;  %s1202_s12 = int_to_ptr.vmem [resolvable:$true] %s247_s12 }
  0x21   : > { %s1188_s14 = scalar_lea.hbm %s1413_s0, %s733_s10 }
  0x23   : > { %s1200_s27 = scalar_lea.hbm %s1415_s1, %s733_s10  ;;  %s896_s16 = scalar_lea.hbm %s1415_s1, 768 }
  0x24   : > { %s891_s13 = scalar_lea.hbm %s1200_s27, 128  ;;  %p897_p5 = scmp.lt.u32.totalorder %s1200_s27, %s1415_s1 }
  0x25   : > { %p892_p1 = scmp.ne.s32.totalorder %s1200_s27, %s891_s13  ;;  %p898_p6 = scmp.lt.u32.totalorder %s896_s16, %s891_s13 }
  0x26   : > { %p900_p10 = scmp.lt.u32.totalorder %s891_s13, %s1200_s27 }
  0x27   : > { %p894_p3 = pnand %p1211_p2, %p892_p1  ;;  %p899_p7 = por %p898_p6, %p897_p5 }
  0x29   : > { %p895_p4 = pneg %p894_p3  ;;  %p901_p12 = por %p900_p10, %p899_p7 }
  0x2b   : > { %p902_p0 = pnand %p901_p12, %p895_p4 }
  0x2d   : > { %905 = shalt.err (!%p902_p0)
}
  0x2e   : > { %s906_s11 = scalar_lea.vmem %s1202_s12, 128  ;;  %s1069_s10 = smov [#allocation6]  }
  0x2f   : > { %p907_p1 = scmp.ne.s32.totalorder %s1202_s12, %s906_s11  ;;  %s911_s17 = sshll.u32 %s1069_s10, 4  ;;  %s912_s17 = int_to_ptr.vmem [resolvable:$false] %s911_s17 }
  0x30   : > { %s913_s25 = scalar_lea.vmem %s912_s17, 256  ;;  %p914_p9 = scmp.lt.s32.totalorder %s1202_s12, %s912_s17 }
  0x31   : > { %p909_p3 = pnand %p907_p1, %p1211_p2  ;;  %p915_p8 = scmp.lt.s32.totalorder %s913_s25, %s906_s11 }
  0x33   : > { %p910_p11 = pneg %p909_p3  ;;  %p916_p5 = por %p915_p8, %p914_p9 }
  0x35   : > { %p917_p6 = pnand %p916_p5, %p910_p11 }
  0x37   : > { %920 = shalt.err (!%p917_p6)
}
  0x38   : > { %s1399_s13 = smov 64   ;;  %s1400_s16 = smov 4  }
  0x39   : > { %814 = dma.hbm_to_vmem [thread:$0]  (!%p1192_p13), %s1200_s27, 128, %s1202_s12, %s1205_s28, %s1399_s13, %s1399_s13, %s1400_s16  }
  0x3a   : > { %p292_p8 = scmp.lt.s32.totalorder %s1067_s23, 7  ;;  %p1417_p9 = scmp.ge.s32.totalorder %s1067_s23, 1 }
  0x3b   : > { %s732_s11 = sshll.u32 %s1181_s9, 4  ;;  %s217_s25 = scalar_lea.sflag [#allocation4], %s1181_s9 }
  0x3c   : > { %p1241_p11 = pnand %p1417_p9, %p292_p8  ;;  %s220_s10 = scalar_lea.vmem [#allocation3], %s732_s11 }
  0x3d   : > { %s226_s17 = sshll.u32 %s220_s10, 4  ;;  %s921_s1 = scalar_lea.hbm %s1188_s14, 256  ;;  %s1246_s17 = int_to_ptr.vmem [resolvable:$true] %s226_s17 }
  0x3e   : > { %s1418_s29 = scalar_select %p1241_p11, 1, 0 }
  0x3f   : > { %p922_p0 = scmp.ne.s32.totalorder %s1188_s14, %s921_s1  ;;  %s926_s12 = scalar_lea.hbm %s1413_s0, 1536 }
  0x40   : > { %p927_p10 = scmp.lt.u32.totalorder %s1188_s14, %s1413_s0  ;;  %p928_p12 = scmp.lt.u32.totalorder %s926_s12, %s921_s1 }
  0x41   : > { %p924_p4 = pnand %p922_p0, %p1211_p2  ;;  %p930_p3 = scmp.lt.u32.totalorder %s921_s1, %s1188_s14 }
  0x42   : > { %p929_p1 = por %p928_p12, %p927_p10 }
  0x43   : > { %p925_p7 = pneg %p924_p4 }
  0x44   : > { %p931_p5 = por %p930_p3, %p929_p1 }
  0x46   : > { %p932_p6 = pnand %p931_p5, %p925_p7 }
  0x48   : > { %935 = shalt.err (!%p932_p6)
}
  0x49   : > { %s936_s11 = scalar_lea.vmem %s1246_s17, 256  ;;  %s1072_s7 = smov [#allocation3]  }
  0x4a   : > { %p937_p8 = scmp.ne.s32.totalorder %s1246_s17, %s936_s11  ;;  %s941_s10 = sshll.u32 %s1072_s7, 4  ;;  %s942_s10 = int_to_ptr.vmem [resolvable:$false] %s941_s10 }
  0x4b   : > { %s943_s13 = scalar_lea.vmem %s942_s10, 512  ;;  %p944_p4 = scmp.lt.s32.totalorder %s1246_s17, %s942_s10 }
  0x4c   : > { %p939_p9 = pnand %p937_p8, %p1211_p2  ;;  %p945_p11 = scmp.lt.s32.totalorder %s943_s13, %s936_s11 }
  0x4e   : > { %p940_p0 = pneg %p939_p9  ;;  %p946_p10 = por %p945_p11, %p944_p4 }
  0x50   : > { %p947_p12 = pnand %p946_p10, %p940_p0 }
  0x52   : > { %950 = shalt.err (!%p947_p12)
}
  0x53   : > { %s1073_s1 = smov 768   ;;  %s1074_s16 = smov 128  }
  0x54   : > { %s1075_s27 = smov 8   ;;  %s737_s12 = sshll.u32 %s1181_s9, 6 }
  0x55   : > { %811 = dma.hbm_to_vmem [thread:$0]  (!%p1192_p13), %s1188_s14, 256, %s1246_s17, %s217_s25, %s1073_s1, %s1074_s16, %s1075_s27  }
  0x56   : > { %s762_s7 = sshll.u32 %s1063_s22, 10  ;;  %s267_s0 = scalar_lea.vmem [#allocation8], %s737_s12 }
  0x57   : > { %s1277_s13 = scalar_lea.hbm %s1393_s3, %s762_s7  ;;  %s275_s20 = sshll.u32 %s267_s0, 4  ;;  %s1279_s20 = int_to_ptr.vmem [resolvable:$true] %s275_s20 }
  0x58   : > { %s951_s8 = scalar_lea.hbm %s1277_s13, 1024  ;;  %s956_s17 = scalar_lea.hbm %s1393_s3, 6144 }
  0x59   : > { %p952_p11 = scmp.ne.s32.totalorder %s1277_s13, %s951_s8  ;;  %p957_p3 = scmp.lt.u32.totalorder %s1277_s13, %s1393_s3 }
  0x5a   : > { %p958_p5 = scmp.lt.u32.totalorder %s956_s17, %s951_s8  ;;  %p960_p8 = scmp.lt.u32.totalorder %s951_s8, %s1277_s13 }
  0x5b   : > { %p954_p7 = pnand %p952_p11, %p1211_p2 }
  0x5c   : > { %p959_p6 = por %p958_p5, %p957_p3 }
  0x5d   : > { %p955_p1 = pneg %p954_p7 }
  0x5e   : > { %p961_p9 = por %p960_p8, %p959_p6 }
  0x60   : > { %p962_p0 = pnand %p961_p9, %p955_p1 }
  0x62   : > { %965 = shalt.err (!%p962_p0)
}
  0x63   : > { %s966_s0 = scalar_lea.vmem %s1279_s20, 1024  ;;  %s1076_s16 = smov [#allocation8]  }
  0x64   : > { %p967_p4 = scmp.ne.s32.totalorder %s1279_s20, %s966_s0  ;;  %s971_s27 = sshll.u32 %s1076_s16, 4  ;;  %s972_s27 = int_to_ptr.vmem [resolvable:$false] %s971_s27 }
  0x65   : > { %s973_s12 = scalar_lea.vmem %s972_s27, 2048  ;;  %p974_p11 = scmp.lt.s32.totalorder %s1279_s20, %s972_s27 }
  0x66   : > { %p969_p10 = pnand %p967_p4, %p1211_p2  ;;  %p975_p7 = scmp.lt.s32.totalorder %s973_s12, %s966_s0 }
  0x68   : > { %p970_p12 = pneg %p969_p10  ;;  %p976_p3 = por %p975_p7, %p974_p11 }
  0x6a   : > { %p977_p5 = pnand %p976_p3, %p970_p12 }
  0x6c   : > { %980 = shalt.err (!%p977_p5)
}
  0x6d   : > { %s1419_s8 = smov 4   ;;  %s1420_s7 = smov 64  }
  0x6e   : > { %817 = dma.hbm_to_vmem [thread:$0]  (!%p1192_p13), %s1277_s13, 1024, %s1279_s20, %s1205_s28, %s1420_s7, %s1420_s7, %s1419_s8  }
  0x6f   : > { %p1421_p2 = scmp.ne.s32.totalorder %s1418_s29, 0 }
  0x70   : > { %s1309_s26 = sand.u32 (!%p1421_p2), 1, %s1051_s19   ;;  %p1422_p1 = scmp.ne.s32.totalorder (!%p1421_p2), %s1408_s30, 0 }
  0x71   : > { %296 = sbr.rel (%p1421_p2) target bundleno = 584 (0x248), region = 40  ;;  %s741_s10 = sshll.u32 (!%p1421_p2), %s1309_s26, 4 }
  0x72   : > { %s299_s11 = scalar_lea.sflag (!%p1421_p2), [#allocation4], %s1309_s26  ;;  %s302_s15 = scalar_lea.vmem (!%p1421_p2), [#allocation3], %s741_s10 }
  0x78   : > { %1034 = dma.done.wait (%p1422_p1), %s299_s11, 256  }
  0x79   : > { %1036 = vsyncadd (%p1422_p1), %s299_s11, 4294967040  ;;  %s307_s20 = sand.u32 1, %s1144_s24   ;;  %s742_s28 = sshll.u32 %s1309_s26, 3 }
  0x7a   : > { %s308_s29 = scalar_lea.sflag [#allocation7], %s307_s20  ;;  %s311_s13 = scalar_lea.vmem [#allocation6], %s742_s28 }
  0x7b   : > { %1038 = dma.done.wait (%p1422_p1), %s308_s29, 1152  }
  0x7c   : > { %1040 = vsyncadd (%p1422_p1), %s308_s29, 4294966144  ;;  %v1077_v0 = vmov 0.0   ;;  %vm1078_vm0 = vmmov 0   ;;  %s743_s9 = sshll.u32 %s1309_s26, 6  ;;  %v882_v1 = vld [vmem:[%s311_s13] sm:$0xff]   ;;  %v381_v3 = vld [vmem:[%s302_s15 + $0x8] sm:$0xff] }
  0x7d   : > { %774 = vmatprep.subr.bf16.mxu0 %v1077_v0  ;;  %776 = vmatprep.mubr.msk.bf16.mxu0 %vm1078_vm0, %v1077_v0  ;;  %v380_v2 = vld [vmem:[%s302_s15] sm:$0xff]  ;;  %s320_s24 = scalar_lea.vmem [#allocation8], %s743_s9  ;;  %vm398_vm1 = vcmask 130048   ;;  %p366_p13 = scmp.lt.s32.totalorder %s1059_s21, 5 }
  0x7e   : > { %780 = vmatprep.subr.bf16.mxu1 %v1077_v0  ;;  %796 = vmatprep.mubr.msk.bf16.mxu1 %vm1078_vm0, %v1077_v0  ;;  %v382_v4 = vpack.c.bf16 %v381_v3, %v380_v2  ;;  %v883_v5 = vld [vmem:[%s320_s24] sm:$0xff]   ;;  %v884_v6 = vld [vmem:[%s320_s24 + $0x8] sm:$0xff]   ;;  %v885_v7 = vld [vmem:[%s320_s24 + $0x10] sm:$0xff]   ;;  %s365_s27 = scalar_lea.vmem [#allocation9], %s741_s10  ;;  %s758_s8 = sshll.u32 %s1059_s21, 7 }
  0x7f   : > { %775 = vmatpush3.bf16.msra.mxu0 %v882_v1  ;;  %781 = vmatpush3.bf16.msra.mxu1 %v883_v5  ;;  %v886_v8 = vld [vmem:[%s320_s24 + $0x18] sm:$0xff]   ;;  %v887_v9 = vld [vmem:[%s320_s24 + $0x20] sm:$0xff]   ;;  %v888_v10 = vld [vmem:[%s320_s24 + $0x28] sm:$0xff]   ;;  %s367_s30 = scalar_select %p366_p13, %s1059_s21, 5 }
  0x80   : > { %782 = vmatprep.subr.bf16.mxu1 %v1077_v0  ;;  %v889_v11 = vld [vmem:[%s320_s24 + $0x30] sm:$0xff]   ;;  %v890_v12 = vld [vmem:[%s320_s24 + $0x38] sm:$0xff]   ;;  %s580_s12 = sshll.u32 %s365_s27, 4  ;;  %s1342_s15 = scalar_lea.hbm %s1395_s5, %s758_s8  ;;  %s1337_s12 = int_to_ptr.vmem [resolvable:$true] %s580_s12 }
  0x81   : > { %s368_s25 = scalar_lea.vmem %s1392_s2, %s367_s30  ;;  %s374_s16 = scalar_lea.vmem %s1394_s4, %s367_s30 }
  0x82   : > { %777 = vmatmul.mubr.msk.bf16.vlgmr.msra.gmra.mrb[0].mxu0 %vm398_vm1, %v382_v4  ;;  %v745_v13 = vld [vmem:[%s368_s25] ss:$0 sm:$0xff]  ;;  %s567_s10 = scalar_lea.sflag [#allocation5], %s1309_s26  ;;  %s981_s20 = scalar_lea.vmem %s1337_s12, 256 }
  0x83   : > { %783 = vmatpush3.bf16.msra.mxu1 %v884_v6  ;;  %v748_v23 = vld [vmem:[%s374_s16] ss:$0 sm:$0xff]  ;;  %p982_p6 = scmp.ne.s32.totalorder %s1337_s12, %s981_s20  ;;  %p1423_p8 = scmp.ne.s32.totalorder %s1409_s6, 0 }
  0x84   : > { %784 = vmatprep.subr.bf16.mxu1 %v1077_v0  ;;  %s1079_s21 = smov [#allocation9]  }
  0x85   : > { %p983_p9 = pnand %p982_p6, %p1423_p8  ;;  %s985_s28 = sshll.u32 %s1079_s21, 4  ;;  %s986_s28 = int_to_ptr.vmem [resolvable:$false] %s985_s28 }
  0x86   : > { %s987_s29 = scalar_lea.vmem %s986_s28, 512  ;;  %p988_p4 = scmp.lt.s32.totalorder %s1337_s12, %s986_s28 }
  0x87   : > { %785 = vmatpush3.bf16.msra.mxu1 %v885_v7  ;;  %p984_p0 = pneg %p983_p9  ;;  %p989_p10 = scmp.lt.s32.totalorder %s987_s29, %s981_s20 }
  0x88   : > { %786 = vmatprep.subr.bf16.mxu1 %v1077_v0 }
  0x89   : > { %p990_p12 = por %p989_p10, %p988_p4 }
  0x8b   : > { %787 = vmatpush3.bf16.msra.mxu1 %v886_v8  ;;  %p991_p11 = pnand %p990_p12, %p984_p0 }
  0x8c   : > { %788 = vmatprep.subr.bf16.mxu1 %v1077_v0 }
  0x8f   : > { %789 = vmatpush3.bf16.msra.mxu1 %v887_v9 }
  0x90   : > { %790 = vmatprep.subr.bf16.mxu1 %v1077_v0 }
  0x93   : > { %791 = vmatpush3.bf16.msra.mxu1 %v888_v10 }
  0x94   : > { %792 = vmatprep.subr.bf16.mxu1 %v1077_v0 }
  0x97   : > { %793 = vmatpush3.bf16.msra.mxu1 %v889_v11 }
  0x98   : > { %794 = vmatprep.subr.bf16.mxu1 %v1077_v0 }
  0x9b   : > { %795 = vmatpush3.bf16.msra.mxu1 %v890_v12 }
 0x155   : > { %v436_v14 = vpop.f32.mrb[0].mxu0 }
 0x156   : > { %v437_v15 = vadd.f32 %v745_v13, %v436_v14  ;;  %v778_v16 = vpop.f32.mrb[1].mxu0 }
 0x157   : > { %v439_v17 = vpop.f32.mrb[2].mxu0 }
 0x158   : > { %v440_v18 = vadd.f32 %v745_v13, %v439_v17  ;;  %v779_v19 = vpop.f32.mrb[3].mxu0  ;;  %v443_v20 = vmax.f32 %v437_v15, 0.0 }
 0x15a   : > { %v444_v21 = vmax.f32 %v440_v18, 0.0 }
 0x15c   : > { %v449_v22 = vpack.c.bf16 %v444_v21, %v443_v20 }
 0x15e   : > { %797 = vmatmul.mubr.bf16.vlgmr.msra.gmra.mrb[0].mxu1 %v449_v22 }
 0x231   : > { %v555_v24 = vpop.f32.mrb[0].mxu1 }
 0x232   : > { %v556_v25 = vadd.f32 %v748_v23, %v555_v24  ;;  %v798_v26 = vpop.f32.mrb[1].mxu1 }
 0x233   : > { %v558_v27 = vpop.f32.mrb[2].mxu1 }
 0x234   : > { %v562_v28 = vmax.f32 %v556_v25, 0.0  ;;  %v559_v29 = vadd.f32 %v748_v23, %v558_v27  ;;  %v799_v30 = vpop.f32.mrb[3].mxu1 }
 0x236   : > { %564 = vst [vmem:[%s365_s27] sm:$0xff] %v562_v28  ;;  %v563_v31 = vmax.f32 %v559_v29, 0.0 }
 0x238   : > { %565 = vst [vmem:[%s365_s27 + $0x8] sm:$0xff] %v563_v31 }
 0x239   : > { %994 = shalt.err (!%p991_p11)
}
 0x23a   : > { %s995_s13 = scalar_lea.hbm %s1342_s15, 256  ;;  %s999_s30 = scalar_lea.hbm %s1395_s5, 1536 }
 0x23b   : > { %p996_p7 = scmp.ne.s32.totalorder %s1342_s15, %s995_s13  ;;  %p1000_p2 = scmp.lt.u32.totalorder %s1342_s15, %s1395_s5 }
 0x23c   : > { %p1001_p1 = scmp.lt.u32.totalorder %s999_s30, %s995_s13  ;;  %p1003_p6 = scmp.lt.u32.totalorder %s995_s13, %s1342_s15 }
 0x23d   : > { %p997_p3 = pnand %p996_p7, %p1423_p8 }
 0x23e   : > { %p1002_p13 = por %p1001_p1, %p1000_p2 }
 0x23f   : > { %p998_p5 = pneg %p997_p3 }
 0x240   : > { %p1004_p9 = por %p1003_p6, %p1002_p13 }
 0x242   : > { %p1005_p0 = pnand %p1004_p9, %p998_p5 }
 0x244   : > { %1008 = shalt.err (!%p1005_p0)
}
 0x245   : > { %s1080_s25 = smov 128   ;;  %s1081_s1 = smov 768  }
 0x246   : > { %s1082_s0 = smov 8  }
 0x247   : > { %806 = dma.vmem_to_hbm [thread:$0]  (%p1423_p8), %s1337_s12, 256, %s1342_s15, %s567_s10, %s1080_s25, %s1081_s1, %s1082_s0  }
 0x248 PF: > { %s1424_s16 = sld [smem:[#allocation16_spill]]  ;;  %p823_p4 = scmp.ge.s32.totalorder %s1067_s23, 2 }
 0x249   : > { %s595_s27 = sand.u32 1, %s1047_s18  }
 0x24a   : > { %s596_s8 = scalar_lea.sflag [#allocation5], %s595_s27 }
 0x24e   : > { %p1425_p10 = scmp.ne.s32.totalorder %s1424_s16, 0 }
 0x250   : > { %p819_p12 = pnand %p823_p4, %p1425_p10 }
 0x252   : > { %1042 = dma.done.wait (!%p819_p12), %s596_s8, 256  }
 0x253   : > { %1044 = vsyncadd (!%p819_p12), %s596_s8, 4294967040  ;;  %s24_s23 = sadd.s32 1, %s1067_s23   ;;  %s1426_s7 = sld [smem:[#allocation13_spill]] }
 0x254   : > { %p21_p11 = scmp.ge.s32.totalorder %s24_s23, 8   ;;  %s1427_s20 = sld [smem:[#allocation15_spill]] }
 0x255   : > { %s1428_s6 = sld [smem:[#allocation14_spill]]  ;;  %s1429_s18 = smov %s1051_s19 }
 0x256   : > { %s1431_s21 = smov %s1063_s22  ;;  %23 = sbr.rel (!%p21_p11) target bundleno = 11 (0xb), region = 119 }
 0x259   : > { %s1430_s19 = smov %s1426_s7 }
 0x25b   : > { %s1432_s22 = smov %s1428_s6 }
 0x25d   :  { %601 = vsyncpa [#allocation4], 1 }
 0x25e   :  { %603 = vsyncpa [#allocation4 + $0x1], 1 }
 0x25f   :  { %604 = vsyncpa [#allocation7], 1 }
 0x260   :  { %606 = vsyncpa [#allocation7 + $0x1], 1 }
 0x261   :  { %607 = vsyncpa [#allocation5], 1 }
 0x262   :  { %609 = vsyncpa [#allocation5 + $0x1], 1 }

</bundles_post_ra>
